<compile_context>
chip_gen: v7x
topology: tpu7x:2x2x1
jax: 0.10.0
libtpu: 0.0.40
codegen_flags: <defaults>
</compile_context>

<pallas_src>
import jax
import jax.numpy as jnp
from jax import lax
from jax.experimental import pallas as pl
from jax.experimental.pallas import tpu as pltpu


# Grid steps over the (truncated, padded) mode axis.
#   2 -> both v7x TensorCores get work via dimension_semantics=("parallel",);
#        on v5e/v6e the second step only adds ~0.35us of pipeline overhead.
NUM_GRID_STEPS = 2


def _round_up(v, m):
    return (v + m - 1) // m * m


def _spectral_mul_kernel(x_ref, w_ref, o_ref):
    # x_ref: (MT, Bp, Kp)   per-mode [xr | xi] activations
    # w_ref: (MT, Kp, Np)   per-mode block-complex weights
    # o_ref: (MT, Bp, Np)   per-mode [yr | yi] output, lane-dense (Np % 128 == 0)
    # Explicit batched dot_general -> Mosaic lowers to batched vmatmul directly,
    # contracting x dim 2 with w dim 1, batching dim 0 of both (no transpose).
    o_ref[...] = lax.dot_general(
        x_ref[...],
        w_ref[...],
        dimension_numbers=(((2,), (1,)), ((0,), (0,))),
        preferred_element_type=jnp.float32,
    ).astype(o_ref.dtype)


def prepare_spectral_weights(weights_real, weights_imag,
                             compute_dtype=jnp.float32,
                             num_grid_steps=NUM_GRID_STEPS):
    """Hoisted weight prep (call once per parameter set).

    Builds the block-complex weight tensor of shape (Fp, Kp, Np):
        W[m] = [[wr_m,  wi_m],
                [-wi_m, wr_m]]
    with Fp = round_up(modes1, num_grid_steps)  (only the LIVE modes -- the zero
    part of the spectrum is handled in the wrapper, not streamed through the MXU),
    Kp = round_up(2*Cin, 8) and Np = round_up(2*Cout, 128) for lane-dense stores.
    """
    Cin, Cout, modes1 = weights_real.shape
    K, Nw = 2 * Cin, 2 * Cout
    Kp = _round_up(K, 8)
    Np = _round_up(Nw, 128)
    Fp = _round_up(modes1, num_grid_steps)

    wr = jnp.transpose(weights_real.astype(jnp.float32), (2, 0, 1))  # (modes1, Cin, Cout)
    wi = jnp.transpose(weights_imag.astype(jnp.float32), (2, 0, 1))
    top = jnp.concatenate([wr, wi], axis=-1)      # columns: [real-out | imag-out]
    bot = jnp.concatenate([-wi, wr], axis=-1)
    w = jnp.concatenate([top, bot], axis=1)       # (modes1, 2*Cin, 2*Cout)
    w = jnp.pad(w, ((0, Fp - modes1), (0, Kp - K), (0, Np - Nw)))
    return w.astype(compute_dtype)


def spectral_conv1d_apply(x, w_fused, out_channels, modes1,
                          compute_dtype=jnp.float32):
    """Forward pass given pre-assembled block-complex weights.

    x        : (B, C_in, N) float32
    w_fused  : (Fp, Kp, Np) from prepare_spectral_weights
    returns  : (B, out_channels, N) float32
    """
    B, Cin, N = x.shape
    n_freq = N // 2 + 1
    if modes1 > n_freq:
        raise ValueError(f"modes1={modes1} exceeds n_freq={n_freq}")
    K = 2 * Cin
    Fp, Kp, Np = w_fused.shape
    Bp = _round_up(B, 8)
    Cout = out_channels

    # Tiling derived from w_fused so prep/apply can never disagree silently.
    num_steps = NUM_GRID_STEPS if Fp % NUM_GRID_STEPS == 0 else 1
    mode_tile = Fp // num_steps

    # --- glue: rfft, truncate to modes1 FIRST, then one re-layout of the live modes ---
    x_ft = jnp.fft.rfft(x, axis=-1)[:, :, :modes1]                   # (B, Cin, modes1) c64
    x_ft = jnp.transpose(x_ft, (2, 0, 1))                            # (modes1, B, Cin)
    X = jnp.concatenate(
        [jnp.real(x_ft), jnp.imag(x_ft)], axis=-1
    ).astype(jnp.float32)                                            # (modes1, B, 2*Cin)
    X = jnp.pad(X, ((0, Fp - modes1), (0, Bp - B), (0, Kp - K)))     # (Fp, Bp, Kp)
    X = X.astype(compute_dtype)

    # VMEM budget: double-buffered in/out tiles, headroom included, capped at v7x's
    # 64 MiB physical VMEM (safe on v5e/v6e which have 128 MiB).
    in_bytes = jnp.dtype(compute_dtype).itemsize
    step_bytes = mode_tile * (Bp * Kp * in_bytes + Kp * Np * in_bytes + Bp * Np * 4)
    vmem_limit = int(min(max(4 * step_bytes, 32 * 1024 * 1024), 64 * 1024 * 1024))

    # --- hot path: block-complex channel mixing over the live modes only ---
    out = pl.pallas_call(
        _spectral_mul_kernel,
        out_shape=jax.ShapeDtypeStruct((Fp, Bp, Np), jnp.float32),
        grid=(num_steps,),
        in_specs=[
            pl.BlockSpec((mode_tile, Bp, Kp), lambda m: (m, 0, 0)),
            pl.BlockSpec((mode_tile, Kp, Np), lambda m: (m, 0, 0)),
        ],
        out_specs=pl.BlockSpec((mode_tile, Bp, Np), lambda m: (m, 0, 0)),
        compiler_params=pltpu.CompilerParams(
            dimension_semantics=("parallel",),
            vmem_limit_bytes=vmem_limit,
        ),
    )(X, w_fused)

    # --- glue: assemble complex low modes, memset the zero tail, inverse FFT ---
    out_ft = (
        out[:modes1, :B, :Cout] + 1j * out[:modes1, :B, Cout:2 * Cout]
    ).astype(jnp.complex64)                                          # (modes1, B, Cout)
    out_ft = jnp.transpose(out_ft, (1, 2, 0))                        # (B, Cout, modes1)
    out_ft = jnp.pad(out_ft, ((0, 0), (0, 0), (0, n_freq - modes1))) # zero high modes
    return jnp.fft.irfft(out_ft, n=N, axis=-1).astype(jnp.float32)   # (B, Cout, N)


def spectral_conv1d(x, weights_real, weights_imag, modes1, compute_dtype=jnp.float32):
    """Convenience wrapper matching the PyTorch module signature (prep not hoisted)."""
    w_fused = prepare_spectral_weights(weights_real, weights_imag, compute_dtype)
    return spectral_conv1d_apply(x, w_fused, weights_real.shape[1], modes1, compute_dtype)


if __name__ == "__main__":
    # Small, deterministic example consistent with the module's forward.
    B, Cin, Cout, N, modes1 = 2, 4, 4, 16, 5

    key = jax.random.PRNGKey(0)
    kx, kwr, kwi = jax.random.split(key, 3)

    x = jax.random.normal(kx, (B, Cin, N), dtype=jnp.float32)

    # torch.rand(..., dtype=cfloat): real & imag parts ~ U[0,1), scaled by 1/(Cin*Cout)
    scale = 1.0 / (Cin * Cout)
    weights_real = scale * jax.random.uniform(kwr, (Cin, Cout, modes1), dtype=jnp.float32)
    weights_imag = scale * jax.random.uniform(kwi, (Cin, Cout, modes1), dtype=jnp.float32)

    # Weight re-layout hoisted out of the per-forward path (static across calls).
    w_fused = jax.block_until_ready(
        prepare_spectral_weights(weights_real, weights_imag)
    )

    y = spectral_conv1d_apply(x, w_fused, Cout, modes1)
    y = jax.block_until_ready(y)

    # Pure-JAX reference (mirrors the PyTorch forward) for a sanity check.
    n_freq = N // 2 + 1
    w_c = (weights_real + 1j * weights_imag).astype(jnp.complex64)
    x_ft_ref = jnp.fft.rfft(x, axis=-1)
    out_ft_ref = jnp.zeros((B, Cout, n_freq), dtype=jnp.complex64)
    out_ft_ref = out_ft_ref.at[:, :, :modes1].set(
        jnp.einsum("bix,iox->box", x_ft_ref[:, :, :modes1], w_c)
    )
    y_ref = jnp.fft.irfft(out_ft_ref, n=N, axis=-1)

    assert y.shape == (B, Cout, N)
    assert jnp.allclose(y, y_ref, atol=1e-5, rtol=1e-5)
    print("KERNEL_OK")
</pallas_src>

<mosaic_0001>
module attributes {stable_mosaic.version = 11 : i64} {
  func.func @_spectral_mul_kernel(%arg0: i32, %arg1: memref<3x8x8xf32, #tpu.memory_space<vmem>>, %arg2: memref<3x8x128xf32, #tpu.memory_space<vmem>>, %arg3: memref<3x8x128xf32, #tpu.memory_space<vmem>>) attributes {dimension_semantics = [#tpu.dimension_semantics<parallel>], iteration_bounds = array<i64: 2>, scalar_prefetch = 0 : i64, scratch_operands = 0 : i64, tpu.core_type = #tpu.core_type<tc>, window_params = [{transform_indices = @transform_0, window_bounds = array<i64: 3, 8, 8>}, {transform_indices = @transform_1, window_bounds = array<i64: 3, 8, 128>}, {transform_indices = @transform_2, window_bounds = array<i64: 3, 8, 128>}]} {
    %c0 = arith.constant 0 : index
    %c0_0 = arith.constant 0 : index
    %c0_1 = arith.constant 0 : index
    %0 = vector.load %arg1[%c0, %c0_0, %c0_1] : memref<3x8x8xf32, #tpu.memory_space<vmem>>, vector<3x8x8xf32>
    %c0_2 = arith.constant 0 : index
    %c0_3 = arith.constant 0 : index
    %c0_4 = arith.constant 0 : index
    %1 = vector.load %arg2[%c0_2, %c0_3, %c0_4] : memref<3x8x128xf32, #tpu.memory_space<vmem>>, vector<3x8x128xf32>
    %cst = arith.constant dense<0.000000e+00> : vector<3x8x128xf32>
    %2 = tpu.matmul %0, %1, %cst {dimension_numbers = #tpu.dot_dimension_numbers<[2], [1], [1], [2], [0, 0, 0, 1, 1, 2], [0], [0]>} : vector<3x8x8xf32>, vector<3x8x128xf32>, vector<3x8x128xf32> -> vector<3x8x128xf32>
    %c0_5 = arith.constant 0 : index
    %c0_6 = arith.constant 0 : index
    %c0_7 = arith.constant 0 : index
    %3 = vector.load %arg3[%c0_5, %c0_6, %c0_7] : memref<3x8x128xf32, #tpu.memory_space<vmem>>, vector<3x8x128xf32>
    tpu.vector_store %arg3[%c0_5, %c0_6, %c0_7], %2 {strides = array<i32>} : memref<3x8x128xf32, #tpu.memory_space<vmem>>, vector<3x8x128xf32>,
    return
  }
  func.func @transform_0(%arg0: i32) -> (i32, i32, i32) {
    %c0_i32 = arith.constant 0 : i32
    %c0_i32_0 = arith.constant 0 : i32
    %c0_i32_1 = arith.constant 0 : i32
    return %arg0, %c0_i32, %c0_i32_0 : i32, i32, i32
  }
  func.func @transform_1(%arg0: i32) -> (i32, i32, i32) {
    %c0_i32 = arith.constant 0 : i32
    %c0_i32_0 = arith.constant 0 : i32
    %c0_i32_1 = arith.constant 0 : i32
    return %arg0, %c0_i32, %c0_i32_0 : i32, i32, i32
  }
  func.func @transform_2(%arg0: i32) -> (i32, i32, i32) {
    %c0_i32 = arith.constant 0 : i32
    %c0_i32_0 = arith.constant 0 : i32
    %c0_i32_1 = arith.constant 0 : i32
    return %arg0, %c0_i32, %c0_i32_0 : i32, i32, i32
  }
}

</mosaic_0001>

<bundles_post_ra>
// kernel: tpu_custom_call.1
= control target key start
LH: loop header
LB: loop body
LE: loop exit
PB: predicated region body
PF: predicated region fallthrough
CT: control target
= control target key end

     0   :  { %7 = vsyncpa [#allocation3], 0  ;;  %s1016_s0 = inlined_call_operand.hbm [shape: f32[6,8,8], index: 0, kind: input, shape index: {}]   ;;  %s1017_s1 = inlined_call_operand.hbm [shape: f32[6,8,128], index: 1, kind: input, shape index: {}]   ;;  %s1018_s2 = inlined_call_operand.hbm [shape: f32[6,8,128], index: 2, kind: output, shape index: {}]  }
   0x1   :  { %9 = vsyncpa [#allocation3 + $0x1], 0 }
   0x2   :  { %10 = vsyncpa [#allocation6], 0 }
   0x3   :  { %12 = vsyncpa [#allocation6 + $0x1], 0 }
   0x4   :  { %13 = vsyncpa [#allocation4], 0 }
   0x5   :  { %15 = vsyncpa [#allocation4 + $0x1], 0  ;;  %s796_s9 = smov 0   ;;  %s798_s10 = smov 0  }
   0x6   :  { %s800_s11 = smov 0   ;;  %s802_s12 = smov 0  }
   0x7 LB: > { %s817_s13 = sadd.s32 4294967295, %s770_s12   ;;  %s544_s14 = sadd.s32 4294967294, %s770_s12   ;;  %s770_s12 = sphi %s802_s12, %s1033_s12   ;;  %s766_s11 = sphi %s800_s11, %s1032_s11   ;;  %s762_s10 = sphi %s798_s10, %s1031_s10   ;;  %s758_s9 = sphi %s796_s9, %s1030_s9  }
   0x8   : > { %s821_s15 = sadd.s32 1, %s770_s12   ;;  %s28_s16 = sadd.s32 1, %s766_s11 }
   0x9   : > { %s25_s17 = ssub.s32 %s770_s12, %s821_s15  ;;  %p35_p0 = scmp.ne.s32.totalorder %s766_s11, %s762_s10 }
   0xa   : > { %p26_p1 = scmp.eq.s32.totalorder %s25_s17, 0  ;;  %p36_p2 = scmp.eq.s32.totalorder %s770_s12, 0 }
   0xb   : > { %p41_p3 = scmp.ne.s32.totalorder %s762_s10, %s758_s9  ;;  %p42_p4 = scmp.eq.s32.totalorder %s817_s13, 0 }
   0xc   : > { %s833_s18 = scalar_select %p26_p1, %s766_s11, %s28_s16  }
   0xd   : > { %p37_p5 = por %p36_p2, %p35_p0  ;;  %p835_p6 = por %p42_p4, %p41_p3 }
   0xe   : > { %p91_p7 = scmp.eq.s32.totalorder %s817_s13, 1  ;;  %p97_p8 = scmp.eq.s32.totalorder %s544_s14, 1 }
   0xf   : > { %s1021_s19 = scalar_select %p835_p6, 1, 0 }
  0x10   : > { %p600_p10 = scmp.lt.s32.totalorder %s770_s12, 2  ;;  %p842_p11 = por %p91_p7, %p35_p0 }
  0x11   : > { %p846_p12 = por %p97_p8, %p41_p3  ;;  %s851_s22 = sand.u32 1, %s766_s11  }
  0x12   : > { %s1022_s20 = scalar_select %p842_p11, 1, 0 }
  0x13   : > { %s1023_s21 = scalar_select %p846_p12, 1, 0 }
  0x14   : > { %s556_s23 = smul.u32 384, %s770_s12  ;;  %p862_p13 = pnand %p600_p10, %p37_p5 }
  0x15   : > { %s580_s24 = smul.u32 24, %s851_s22  ;;  %s118_s3 = scalar_lea.sflag [#allocation3], %s851_s22 }
  0x16   : > { %s860_s27 = scalar_lea.hbm %s1016_s0, %s556_s23  ;;  %p642_p1 = pneg %p862_p13 }
  0x17   : > { %s121_s29 = scalar_lea.vmem [#allocation2], %s580_s24  ;;  %s640_s4 = scalar_lea.hbm %s860_s27, 384 }
  0x18   : > { %s128_s30 = sshll.u32 %s121_s29, 4  ;;  %p641_p0 = scmp.ne.s32.totalorder %s860_s27, %s640_s4  ;;  %s868_s30 = int_to_ptr.vmem [resolvable:$true] %s128_s30 }
  0x19   : > { %s645_s7 = scalar_lea.hbm %s1016_s0, 768  ;;  %p646_p4 = scmp.lt.u32.totalorder %s860_s27, %s1016_s0 }
  0x1a   : > { %p643_p2 = pnand %p642_p1, %p641_p0  ;;  %p647_p5 = scmp.lt.u32.totalorder %s645_s7, %s640_s4 }
  0x1b   : > { %p649_p8 = scmp.lt.u32.totalorder %s640_s4, %s860_s27 }
  0x1c   : > { %p644_p3 = pneg %p643_p2  ;;  %p648_p7 = por %p647_p5, %p646_p4 }
  0x1e   : > { %p650_p10 = por %p649_p8, %p648_p7 }
  0x20   : > { %p651_p9 = pnand %p650_p10, %p644_p3 }
  0x22   : > { %654 = shalt.err (!%p651_p9)
}
  0x23   : > { %s655_s16 = scalar_lea.vmem %s868_s30, 384  ;;  %s772_s17 = smov [#allocation2]  }
  0x24   : > { %p656_p0 = scmp.ne.s32.totalorder %s868_s30, %s655_s16  ;;  %s660_s25 = sshll.u32 %s772_s17, 4  ;;  %s661_s25 = int_to_ptr.vmem [resolvable:$false] %s660_s25 }
  0x25   : > { %s662_s26 = scalar_lea.vmem %s661_s25, 768  ;;  %p663_p11 = scmp.lt.s32.totalorder %s868_s30, %s661_s25 }
  0x26   : > { %p658_p2 = pnand %p656_p0, %p642_p1  ;;  %p664_p4 = scmp.lt.s32.totalorder %s662_s26, %s655_s16 }
  0x28   : > { %p659_p12 = pneg %p658_p2  ;;  %p665_p5 = por %p664_p4, %p663_p11 }
  0x2a   : > { %p666_p7 = pnand %p665_p5, %p659_p12 }
  0x2c   : > { %669 = shalt.err (!%p666_p7)
}
  0x2d   : > { %s773_s29 = smov 128   ;;  %s774_s4 = smov 8  }
  0x2e   : > { %592 = dma.hbm_to_vmem [thread:$0]  (!%p862_p13), %s860_s27, 384, %s868_s30, %s118_s3, %s773_s29, %s773_s29, %s774_s4  }
  0x2f   : > { %p549_p9 = scmp.ge.s32.totalorder %s770_s12, 1  ;;  %p157_p11 = scmp.lt.s32.totalorder %s770_s12, 3 }
  0x30   : > { %s912_s8 = scalar_lea.hbm %s1017_s1, %s556_s23  ;;  %s142_s14 = scalar_lea.vmem [#allocation5], %s580_s24 }
  0x31   : > { %p903_p12 = pnand %p549_p9, %p157_p11  ;;  %s149_s16 = sshll.u32 %s142_s14, 4  ;;  %s916_s16 = int_to_ptr.vmem [resolvable:$true] %s149_s16 }
  0x32   : > { %s139_s27 = scalar_lea.sflag [#allocation6], %s851_s22  ;;  %s670_s30 = scalar_lea.hbm %s912_s8, 384 }
  0x33   : > { %p671_p3 = scmp.ne.s32.totalorder %s912_s8, %s670_s30  ;;  %s675_s23 = scalar_lea.hbm %s1017_s1, 768 }
  0x34   : > { %p676_p0 = scmp.lt.u32.totalorder %s912_s8, %s1017_s1  ;;  %p677_p2 = scmp.lt.u32.totalorder %s675_s23, %s670_s30 }
  0x35   : > { %p673_p8 = pnand %p671_p3, %p642_p1  ;;  %p679_p5 = scmp.lt.u32.totalorder %s670_s30, %s912_s8 }
  0x36   : > { %p678_p4 = por %p677_p2, %p676_p0 }
  0x37   : > { %p674_p10 = pneg %p673_p8 }
  0x38   : > { %p680_p7 = por %p679_p5, %p678_p4 }
  0x3a   : > { %p681_p9 = pnand %p680_p7, %p674_p10 }
  0x3c   : > { %684 = shalt.err (!%p681_p9)
}
  0x3d   : > { %s685_s24 = scalar_lea.vmem %s916_s16, 384  ;;  %s775_s6 = smov [#allocation5]  }
  0x3e   : > { %p686_p11 = scmp.ne.s32.totalorder %s916_s16, %s685_s24  ;;  %s690_s7 = sshll.u32 %s775_s6, 4  ;;  %s691_s7 = int_to_ptr.vmem [resolvable:$false] %s690_s7 }
  0x3f   : > { %s692_s14 = scalar_lea.vmem %s691_s7, 768  ;;  %p693_p6 = scmp.lt.s32.totalorder %s916_s16, %s691_s7 }
  0x40   : > { %p688_p3 = pnand %p686_p11, %p642_p1  ;;  %p694_p0 = scmp.lt.s32.totalorder %s692_s14, %s685_s24 }
  0x42   : > { %p689_p8 = pneg %p688_p3  ;;  %p695_p2 = por %p694_p0, %p693_p6 }
  0x44   : > { %p696_p4 = pnand %p695_p2, %p689_p8 }
  0x46   : > { %699 = shalt.err (!%p696_p4)
}
  0x47   : > { %595 = dma.hbm_to_vmem [thread:$0]  (!%p862_p13), %s912_s8, 384, %s916_s16, %s139_s27, %s773_s29, %s773_s29, %s774_s4  }
  0x48   : > { %161 = sbr.rel (%p903_p12) target bundleno = 317 (0x13d), region = 28  ;;  %s950_s30 = sand.u32 (!%p903_p12), 1, %s762_s10  }
  0x49   : > { %s582_s3 = smul.u32 (!%p903_p12), 24, %s950_s30  ;;  %s164_s17 = scalar_lea.sflag (!%p903_p12), [#allocation3], %s950_s30 }
  0x4a   : > { %p1026_p6 = scmp.ne.s32.totalorder (!%p903_p12), %s1021_s19, 0 }
  0x4b   : > { %s167_s28 = scalar_lea.vmem (!%p903_p12), [#allocation2], %s582_s3 }
  0x4f   : > { %745 = dma.done.wait (%p1026_p6), %s164_s17, 384  }
  0x50   : > { %747 = vsyncadd (%p1026_p6), %s164_s17, 4294966912  ;;  %s173_s22 = scalar_lea.sflag [#allocation6], %s950_s30  ;;  %s176_s29 = scalar_lea.vmem [#allocation5], %s582_s3 }
  0x51   : > { %749 = dma.done.wait (%p1026_p6), %s173_s22, 384  }
  0x52   : > { %751 = vsyncadd (%p1026_p6), %s173_s22, 4294966912  ;;  %v776_v0 = vmov 0.0   ;;  %vm777_vm0 = vmmov 0   ;;  %vm211_vm1 = vcmask 64512   ;;  %v208_v1 = vld [vmem:[%s176_s29] sm:$0xff]  ;;  %v205_v2 = vld [vmem:[%s167_s28] sm:$0xff] }
  0x53   : > { %565 = vmatprep.subr.mxu0 %v776_v0  ;;  %567 = vmatprep.mubr.msk.f32.mxu0 %vm777_vm0, %v776_v0  ;;  %v210_v3 = vld [vmem:[%s176_s29 + $0x10] sm:$0xff]  ;;  %v209_v4 = vld [vmem:[%s176_s29 + $0x8] sm:$0xff]  ;;  %v206_v5 = vld [vmem:[%s167_s28 + $0x8] sm:$0xff]  ;;  %s201_s19 = scalar_lea.vmem [#allocation7], %s582_s3  ;;  %s558_s5 = smul.u32 384, %s817_s13 }
  0x54   : > { %570 = vmatprep.subr.mxu1 %v776_v0  ;;  %572 = vmatprep.mubr.msk.f32.mxu1 %vm777_vm0, %v776_v0  ;;  %v207_v6 = vld [vmem:[%s167_s28 + $0x10] sm:$0xff]  ;;  %s448_s4 = sshll.u32 %s201_s19, 4  ;;  %s435_s13 = scalar_lea.sflag [#allocation4], %s950_s30  ;;  %s967_s4 = int_to_ptr.vmem [resolvable:$true] %s448_s4 }
  0x55   : > { %566 = vmatpush3.msra.mxu0 %v208_v1  ;;  %571 = vmatpush3.msra.mxu1 %v209_v4  ;;  %s972_s27 = scalar_lea.hbm %s1018_s2, %s558_s5  ;;  %s700_s23 = scalar_lea.vmem %s967_s4, 384 }
  0x56   : > { %568 = vmatmul.mubr.msk.f32.vlgmr.msra.gmra.mrb[0].mxu0 %vm211_vm1, %v205_v2  ;;  %575 = vmatprep.subr.mxu0 %v776_v0  ;;  %p701_p13 = scmp.ne.s32.totalorder %s967_s4, %s700_s23  ;;  %p1027_p1 = scmp.ne.s32.totalorder %s1022_s20, 0 }
  0x57   : > { %576 = vmatpush3.msra.mxu0 %v210_v3  ;;  %577 = vmatprep.mubr.msk.f32.mxu0 %vm777_vm0, %v776_v0  ;;  %s778_s25 = smov [#allocation7]  }
  0x58   : > { %573 = vmatmul.mubr.msk.f32.vlgmr.msra.gmra.mrb[0].mxu1 %vm211_vm1, %v206_v5  ;;  %p702_p12 = pnand %p701_p13, %p1027_p1  ;;  %s704_s26 = sshll.u32 %s778_s25, 4  ;;  %s705_s26 = int_to_ptr.vmem [resolvable:$false] %s704_s26 }
  0x59   : > { %s706_s24 = scalar_lea.vmem %s705_s26, 768  ;;  %p707_p5 = scmp.lt.s32.totalorder %s967_s4, %s705_s26 }
  0x5a   : > { %578 = vmatmul.mubr.msk.f32.vlgmr.msra.gmra.mrb[2].mxu0 %vm211_vm1, %v207_v6  ;;  %p703_p10 = pneg %p702_p12  ;;  %p708_p7 = scmp.lt.s32.totalorder %s706_s24, %s700_s23 }
  0x5c   : > { %p709_p9 = por %p708_p7, %p707_p5 }
  0x5e   : > { %p710_p11 = pnand %p709_p9, %p703_p10 }
 0x129   : > { %v281_v7 = vpop.f32.mrb[0].mxu0 }
 0x12a   : > { %431 = vst [vmem:[%s201_s19] sm:$0xff] %v281_v7  ;;  %v569_v8 = vpop.f32.mrb[1].mxu0 }
 0x12b   : > { %v354_v9 = vpop.f32.mrb[0].mxu1 }
 0x12c   : > { %432 = vst [vmem:[%s201_s19 + $0x8] sm:$0xff] %v354_v9  ;;  %v574_v10 = vpop.f32.mrb[1].mxu1 }
 0x12d   : > { %v427_v11 = vpop.f32.mrb[2].mxu0 }
 0x12e   : > { %433 = vst [vmem:[%s201_s19 + $0x10] sm:$0xff] %v427_v11  ;;  %v579_v12 = vpop.f32.mrb[3].mxu0 }
 0x12f   : > { %713 = shalt.err (!%p710_p11)
}
 0x130   : > { %s714_s6 = scalar_lea.hbm %s972_s27, 384  ;;  %s718_s3 = scalar_lea.hbm %s1018_s2, 768 }
 0x131   : > { %p715_p3 = scmp.ne.s32.totalorder %s972_s27, %s714_s6  ;;  %p719_p2 = scmp.lt.u32.totalorder %s972_s27, %s1018_s2 }
 0x132   : > { %p720_p4 = scmp.lt.u32.totalorder %s718_s3, %s714_s6  ;;  %p722_p13 = scmp.lt.u32.totalorder %s714_s6, %s972_s27 }
 0x133   : > { %p716_p8 = pnand %p715_p3, %p1027_p1 }
 0x134   : > { %p721_p6 = por %p720_p4, %p719_p2 }
 0x135   : > { %p717_p0 = pneg %p716_p8 }
 0x136   : > { %p723_p12 = por %p722_p13, %p721_p6 }
 0x138   : > { %p724_p10 = pnand %p723_p12, %p717_p0 }
 0x13a   : > { %727 = shalt.err (!%p724_p10)
}
 0x13b   : > { %s779_s22 = smov 128   ;;  %s780_s29 = smov 8  }
 0x13c   : > { %587 = dma.vmem_to_hbm [thread:$0]  (%p1027_p1), %s967_s4, 384, %s972_s27, %s435_s13, %s779_s22, %s779_s22, %s780_s29  }
 0x13d PF: > { %s463_s19 = sand.u32 1, %s758_s9   ;;  %p1028_p5 = scmp.ne.s32.totalorder %s1023_s21, 0 }
 0x13e   : > { %p1029_p7 = scmp.ge.s32.totalorder %s770_s12, 2  ;;  %s464_s5 = scalar_lea.sflag [#allocation4], %s463_s19 }
 0x140   : > { %p597_p9 = pnand %p1029_p7, %p1028_p5 }
 0x142   : > { %753 = dma.done.wait (!%p597_p9), %s464_s5, 384  }
 0x143   : > { %755 = vsyncadd (!%p597_p9), %s464_s5, 4294966912  ;;  %p18_p11 = scmp.ge.s32.totalorder %s821_s15, 4   ;;  %s1030_s9 = smov %s762_s10 }
 0x144   : > { %s1031_s10 = smov %s766_s11  ;;  %s1032_s11 = smov %s833_s18 }
 0x145   : > { %s1033_s12 = smov %s821_s15  ;;  %20 = sbr.rel (!%p18_p11) target bundleno = 7 (0x7), region = 86 }
 0x14c   :  { %469 = vsyncpa [#allocation3], 1 }
 0x14d   :  { %471 = vsyncpa [#allocation3 + $0x1], 1 }
 0x14e   :  { %472 = vsyncpa [#allocation6], 1 }
 0x14f   :  { %474 = vsyncpa [#allocation6 + $0x1], 1 }
 0x150   :  { %475 = vsyncpa [#allocation4], 1 }
 0x151   :  { %477 = vsyncpa [#allocation4 + $0x1], 1 }

</bundles_post_ra>
